<compile_context>
chip_gen: v5e
topology: v5e:2x2
jax: 0.10.0
libtpu: 0.0.40
codegen_flags: <defaults>
</compile_context>

<pallas_src>
import jax
import jax.numpy as jnp
from jax.experimental import pallas as pl
from jax.experimental.pallas import tpu as pltpu


def _linear_relu_kernel(w_ref, b_ref, x_ref, o_ref):
    # w_ref: (O, K)   -- shared across the grid
    # b_ref: (O, 1)   -- shared across the grid (f32)
    # x_ref: (K, T)   -- current lane tile
    # o_ref: (O, T)
    y = jnp.dot(w_ref[...], x_ref[...], preferred_element_type=jnp.float32)
    y = y + b_ref[...]                       # broadcast bias over lanes
    o_ref[...] = jnp.maximum(y, 0.0).astype(o_ref.dtype)


def _round_up(x, m):
    return (x + m - 1) // m * m


def _round_down(x, m):
    return x // m * m


def _tpu_generation_defaults():
    """(max_lane_tile, vmem_budget_bytes, num_tensorcores) per TPU generation."""
    kind = ""
    try:
        kind = jax.devices()[0].device_kind.lower()
    except Exception:
        pass
    if "v7" in kind:
        # v7x: 3.2 TB/s HBM, 64 MiB physical / 32 MiB scoped VMEM, 2 TCs.
        return 32768, 24 * 1024 * 1024, 2
    if "v6" in kind:
        return 16384, 48 * 1024 * 1024, 1
    if "v5" in kind:
        return 8192, 32 * 1024 * 1024, 1
    # Unknown generation: conservative budget, assume 2 cores so work splits.
    return 16384, 24 * 1024 * 1024, 2


def linear_relu(x, weight, bias, *, max_lane_tile=None, vmem_budget_bytes=None,
                small_n_fallback=True):
    """x: (B, noise_length, seq) -> (B, label_length, seq).

    Matches the PyTorch module: transpose(1,2) -> nn.Linear -> ReLU ->
    transpose(1,2).
    """
    B, K, S = x.shape
    O = weight.shape[0]
    N = B * S

    gen_tile, gen_budget, num_tc = _tpu_generation_defaults()
    if max_lane_tile is None:
        max_lane_tile = gen_tile
    if vmem_budget_bytes is None:
        vmem_budget_bytes = gen_budget
    vmem_budget_bytes = int(vmem_budget_bytes)

    # ---- tiny-problem fast path -------------------------------------------
    # A single partially-filled lane tile: padding + two wrapper transposes +
    # pallas_call launch overhead dominate, so plain XLA is faster.
    if small_n_fallback and N < 128:
        y = jnp.einsum("ok,bks->bos", weight.astype(jnp.float32),
                       x.astype(jnp.float32))
        y = y + bias.astype(jnp.float32)[None, :, None]
        return jnp.maximum(y, 0.0).astype(x.dtype)

    itemsize = jnp.dtype(x.dtype).itemsize
    w_itemsize = jnp.dtype(weight.dtype).itemsize
    bias2d = bias.reshape(O, 1).astype(jnp.float32)

    # Double-buffered VMEM footprint: weight + bias are fixed, x-tile and
    # out-tile scale with the lane tile.
    fixed_bytes = 2 * (O * K * w_itemsize + O * 128 * 4)
    bytes_per_lane = 2 * (K + O) * itemsize
    avail = max(vmem_budget_bytes - fixed_bytes, 128 * bytes_per_lane)
    fit_lanes = max(_round_down(avail // bytes_per_lane, 128), 128)

    # ---- lane-dense direct path: S % 128 == 0 ------------------------------
    # No wrapper transpose/reshape: read (B, K, S), write (B, O, S) directly.
    if S % 128 == 0:
        s_tile = min(max_lane_tile, fit_lanes, S)
        # Megacore: with B == 1 make sure the seq axis gives >= 2 grid steps.
        if num_tc >= 2 and B == 1 and S >= 256:
            s_tile = min(s_tile, _round_down(S // 2, 128))
        s_tile = int(max(s_tile, 128))
        grid = (B, pl.cdiv(S, s_tile))

        cost = pl.CostEstimate(
            flops=2 * O * K * B * S,
            transcendentals=0,
            bytes_accessed=(O * K * w_itemsize + O * 4
                            + (B * K * S + B * O * S) * itemsize),
        )
        return pl.pallas_call(
            _linear_relu_kernel,
            out_shape=jax.ShapeDtypeStruct((B, O, S), x.dtype),
            grid_spec=pltpu.PrefetchScalarGridSpec(
                num_scalar_prefetch=0,
                grid=grid,
                in_specs=[
                    pl.BlockSpec((O, K), lambda b, n: (0, 0)),       # weight
                    pl.BlockSpec((O, 1), lambda b, n: (0, 0)),       # bias
                    pl.BlockSpec((pl.Squeezed(), K, s_tile),         # x tile
                                 lambda b, n: (b, 0, n)),
                ],
                out_specs=pl.BlockSpec((pl.Squeezed(), O, s_tile),
                                       lambda b, n: (b, 0, n)),
            ),
            compiler_params=pltpu.CompilerParams(
                dimension_semantics=("parallel", "parallel"),
                vmem_limit_bytes=vmem_budget_bytes),
            cost_estimate=cost,
        )(weight, bias2d, x)

    # ---- fused-lane path (small / non-lane-dense S) -------------------------
    # Layout plumbing outside the kernel: (B, K, S) -> (K, B, S) -> (K, B*S).
    x2d = jnp.transpose(x, (1, 0, 2)).reshape(K, N)

    n_needed = _round_up(N, 128)
    n_tile = min(max_lane_tile, fit_lanes, n_needed)
    # Megacore: guarantee >= 2 grid steps so both TensorCores get work.
    if num_tc >= 2 and n_needed >= 256:
        n_tile = min(n_tile, _round_down(n_needed // 2, 128))
    n_tile = int(max(n_tile, 128))

    n_pad = _round_up(N, n_tile)
    if n_pad != N:
        # Zero-padded lane columns compute relu(bias) and are sliced away.
        x2d = jnp.pad(x2d, ((0, 0), (0, n_pad - N)))

    grid = (n_pad // n_tile,)
    cost = pl.CostEstimate(
        flops=2 * O * K * n_pad,
        transcendentals=0,
        bytes_accessed=(O * K * w_itemsize + O * 4
                        + (K * n_pad + O * n_pad) * itemsize),
    )
    y2d = pl.pallas_call(
        _linear_relu_kernel,
        out_shape=jax.ShapeDtypeStruct((O, n_pad), x.dtype),
        grid_spec=pltpu.PrefetchScalarGridSpec(
            num_scalar_prefetch=0,
            grid=grid,
            in_specs=[
                pl.BlockSpec((O, K), lambda n: (0, 0)),        # weight (shared)
                pl.BlockSpec((O, 1), lambda n: (0, 0)),        # bias   (shared)
                pl.BlockSpec((K, n_tile), lambda n: (0, n)),   # x lane tile
            ],
            out_specs=pl.BlockSpec((O, n_tile), lambda n: (0, n)),
        ),
        compiler_params=pltpu.CompilerParams(
            dimension_semantics=("parallel",),
            vmem_limit_bytes=vmem_budget_bytes),
        cost_estimate=cost,
    )(weight, bias2d, x2d)

    # (O, B*S) -> (B, O, S)
    y = y2d[:, :N].reshape(O, B, S)
    return jnp.transpose(y, (1, 0, 2))


def reference(x, weight, bias):
    # Pure-JAX reference matching the PyTorch forward semantics.
    xt = jnp.transpose(x, (0, 2, 1))                                  # (B,S,K)
    y = jnp.einsum("bsk,ok->bso", xt.astype(jnp.float32),
                   weight.astype(jnp.float32)) + bias.astype(jnp.float32)
    y = jnp.maximum(y, 0.0)
    return jnp.transpose(y, (0, 2, 1)).astype(x.dtype)                # (B,O,S)


if __name__ == "__main__":
    noise_length = 32   # in_features
    label_length = 16   # out_features

    key = jax.random.PRNGKey(0)
    kx1, kx2, kw, kb = jax.random.split(key, 4)

    # Deterministic parameter init (uniform, like torch's default range scale).
    bound = 1.0 / (noise_length ** 0.5)
    weight = jax.random.uniform(kw, (label_length, noise_length),
                                jnp.float32, -bound, bound)
    bias = jax.random.uniform(kb, (label_length,), jnp.float32, -bound, bound)

    # Case 1: module-default tiny shape (B=2, S=8).
    x_small = jax.random.normal(kx1, (2, noise_length, 8), jnp.float32)
    ref_small = reference(x_small, weight, bias)

    # 1a. default path (small-N XLA fast path).
    out_fast = jax.block_until_ready(linear_relu(x_small, weight, bias))
    assert out_fast.shape == (2, label_length, 8)
    assert jnp.allclose(out_fast, ref_small, atol=1e-5, rtol=1e-5)

    # 1b. fused-lane Pallas kernel on the same tiny shape.
    out_fused = jax.block_until_ready(
        linear_relu(x_small, weight, bias, small_n_fallback=False))
    assert out_fused.shape == (2, label_length, 8)
    assert jnp.allclose(out_fused, ref_small, atol=1e-5, rtol=1e-5)

    # Case 2: lane-dense seq (S % 128 == 0) -> direct (B, O, S) Pallas kernel
    # with no wrapper transposes.
    x_dense = jax.random.normal(kx2, (2, noise_length, 256), jnp.float32)
    ref_dense = reference(x_dense, weight, bias)
    out_dense = jax.block_until_ready(linear_relu(x_dense, weight, bias))
    assert out_dense.shape == (2, label_length, 256)
    assert jnp.allclose(out_dense, ref_dense, atol=1e-5, rtol=1e-5)

    print("KERNEL_OK")
</pallas_src>

<mosaic_0001>
module attributes {stable_mosaic.version = 11 : i64} {
  func.func @_linear_relu_kernel(%arg0: i32, %arg1: memref<16x32xf32, #tpu.memory_space<vmem>>, %arg2: memref<16x1xf32, #tpu.memory_space<vmem>>, %arg3: memref<32x128xf32, #tpu.memory_space<vmem>>, %arg4: memref<16x128xf32, #tpu.memory_space<vmem>>) attributes {dimension_semantics = [#tpu.dimension_semantics<parallel>], iteration_bounds = array<i64: 1>, scalar_prefetch = 0 : i64, scratch_operands = 0 : i64, tpu.core_type = #tpu.core_type<tc>, window_params = [{pipeline_mode = #tpu.pipeline_mode<synchronous>, transform_indices = @transform_0, window_bounds = array<i64: 16, 32>}, {pipeline_mode = #tpu.pipeline_mode<synchronous>, transform_indices = @transform_1, window_bounds = array<i64: 16, 1>}, {transform_indices = @transform_2, window_bounds = array<i64: 32, 128>}, {transform_indices = @transform_3, window_bounds = array<i64: 16, 128>}]} {
    %c0 = arith.constant 0 : index
    %c0_0 = arith.constant 0 : index
    %0 = vector.load %arg1[%c0, %c0_0] : memref<16x32xf32, #tpu.memory_space<vmem>>, vector<16x32xf32>
    %c0_1 = arith.constant 0 : index
    %c0_2 = arith.constant 0 : index
    %1 = vector.load %arg3[%c0_1, %c0_2] : memref<32x128xf32, #tpu.memory_space<vmem>>, vector<32x128xf32>
    %cst = arith.constant dense<0.000000e+00> : vector<16x128xf32>
    %2 = tpu.matmul %0, %1, %cst {dimension_numbers = #tpu.dot_dimension_numbers<[1], [0], [0], [1], [0, 0, 1, 1], [], []>} : vector<16x32xf32>, vector<32x128xf32>, vector<16x128xf32> -> vector<16x128xf32>
    %c0_3 = arith.constant 0 : index
    %c0_4 = arith.constant 0 : index
    %3 = vector.load %arg2[%c0_3, %c0_4] : memref<16x1xf32, #tpu.memory_space<vmem>>, vector<16x1xf32>
    %4 = vector.broadcast %3 : vector<16x1xf32> to vector<16x128xf32>
    %5 = arith.addf %2, %4 : vector<16x128xf32>
    %cst_5 = arith.constant 0.000000e+00 : f32
    %6 = vector.broadcast %cst_5 : f32 to vector<16x128xf32>
    %7 = arith.maximumf %5, %6 : vector<16x128xf32>
    %c0_6 = arith.constant 0 : index
    %c0_7 = arith.constant 0 : index
    %8 = vector.load %arg4[%c0_6, %c0_7] : memref<16x128xf32, #tpu.memory_space<vmem>>, vector<16x128xf32>
    tpu.vector_store %arg4[%c0_6, %c0_7], %7 {strides = array<i32>} : memref<16x128xf32, #tpu.memory_space<vmem>>, vector<16x128xf32>,
    return
  }
  func.func @transform_0(%arg0: i32) -> (i32, i32) {
    %c0_i32 = arith.constant 0 : i32
    %c0_i32_0 = arith.constant 0 : i32
    %c0_i32_1 = arith.constant 0 : i32
    return %c0_i32, %c0_i32_0 : i32, i32
  }
  func.func @transform_1(%arg0: i32) -> (i32, i32) {
    %c0_i32 = arith.constant 0 : i32
    %c0_i32_0 = arith.constant 0 : i32
    %c0_i32_1 = arith.constant 0 : i32
    return %c0_i32, %c0_i32_0 : i32, i32
  }
  func.func @transform_2(%arg0: i32) -> (i32, i32) {
    %c0_i32 = arith.constant 0 : i32
    %c0_i32_0 = arith.constant 0 : i32
    return %c0_i32, %arg0 : i32, i32
  }
  func.func @transform_3(%arg0: i32) -> (i32, i32) {
    %c0_i32 = arith.constant 0 : i32
    %c0_i32_0 = arith.constant 0 : i32
    return %c0_i32, %arg0 : i32, i32
  }
}

</mosaic_0001>

<bundles_post_ra>
// kernel: tpu_custom_call.1
= control target key start
LH: loop header
LB: loop body
LE: loop exit
PB: predicated region body
PF: predicated region fallthrough
CT: control target
= control target key end

     0   :  { %8 = vsyncpa [#allocation3], 0  ;;  %s215_s0 = inlined_call_operand.vmem [shape: f32[16,32], index: 0, kind: input, shape index: {}]   ;;  %s216_s1 = inlined_call_operand.vmem [shape: f32[16,1], index: 1, kind: input, shape index: {}]   ;;  %s217_s2 = inlined_call_operand.hbm [shape: f32[32,128], index: 2, kind: input, shape index: {}]   ;;  %s218_s3 = inlined_call_operand.hbm [shape: f32[16,128], index: 3, kind: output, shape index: {}]  }
   0x1   :  { %9 = vsyncpa [#allocation4], 0  ;;  %s18_s14 = sshll.u32 %s217_s2, 4  ;;  %s166_s15 = smov [#allocation2]   ;;  %s19_s14 = int_to_ptr.hbm [resolvable:$true] %s18_s14 }
   0x2   :  { %s20_s16 = sshll.u32 %s166_s15, 4  ;;  %s167_s17 = smov 128   ;;  %s21_s16 = int_to_ptr.vmem [resolvable:$true] %s20_s16 }
   0x3   :  { %s168_s18 = smov 8  }
   0x4   :  { %26 = dma.hbm_to_vmem [thread:$0]  %s19_s14, 512, %s21_s16, [#allocation3], %s167_s17, %s167_s17, %s168_s18  }
   0x5   :  { %162 = dma.done.wait [#allocation3], 512  }
   0x6   :  { %163 = vsyncadd [#allocation3], 4294966784  ;;  %v169_v0 = vmov 0   ;;  %v36_v1 = vld [vmem:[#allocation2 + $0x18] sm:$0xff]  ;;  %v37_v2 = vld [vmem:[%s216_s1] sm:$0xff]  ;;  %vm49_vm0 = vcmask 261120  }
   0x7   :  { %113 = vset.pattern.permute.xlu0 %v169_v0  ;;  %v35_v3 = vld [vmem:[#allocation2 + $0x10] sm:$0xff]  ;;  %68 = vmatpush.msra.mxu0 %v36_v1  ;;  %v34_v4 = vld [vmem:[#allocation2 + $0x8] sm:$0xff]  ;;  %v33_v5 = vld [vmem:[#allocation2] sm:$0xff]  ;;  %s170_s26 = smov [#allocation5]  }
   0x8   :  { %104 = vmatpush.msra.mxu1 %v36_v1  ;;  %41 = vperm.xlu0 %113, %v37_v2   ;;  %v31_v6 = vld [vmem:[%s215_s0] sm:$0xff]  ;;  %v32_v7 = vld [vmem:[%s215_s0 + $0x8] sm:$0xff]  ;;  %s87_s27 = sshll.u32 %s170_s26, 4  ;;  %s89_s0 = sshll.u32 %s218_s3, 4  ;;  %s88_s27 = int_to_ptr.vmem [resolvable:$true] %s87_s27  ;;  %s90_s0 = int_to_ptr.hbm [resolvable:$true] %s89_s0 }
   0x9   :  { %69 = vmatpush.msra.mxu0 %v35_v3  ;;  %v38_v8 = vld [vmem:[%s216_s1 + $0x8] sm:$0xff] }
   0xa   :  { %105 = vmatpush.msra.mxu1 %v35_v3 }
   0xb   :  { %70 = vmatpush.msra.mxu0 %v34_v4 }
   0xc   :  { %106 = vmatpush.msra.mxu1 %v34_v4 }
   0xd   :  { %71 = vmatpush.msra.mxu0 %v33_v5 }
   0xe   :  { %107 = vmatpush.msra.mxu1 %v33_v5  ;;  %102 = vmatmul.msk.f32.vlgmr.msra.gmra.mxu0 %vm49_vm0, %v31_v6 }
   0xf   :  { %103 = vmatmul.msk.f32.vlgmr.msra.gmra.mxu1 %vm49_vm0, %v32_v7 }
  0x10   :  { %46 = vperm.xlu0 %113, %v38_v8  }
  0x7a   :  { %v42_v9 = vpop.permute.xlu0 %41 }
  0x82   :  { %v47_v10 = vpop.permute.xlu0 %46 }
  0x8b   :  { %v73_v11 = vpop.f32.mrf.mxu0 }
  0x8c   :  { %v76_v12 = vpop.f32.mrf.mxu1  ;;  %v74_v13 = vadd.f32 %v73_v11, %v42_v9 }
  0x8d   :  { %v77_v14 = vadd.f32 %v76_v12, %v47_v10 }
  0x8e   :  { %v79_v15 = vmax.f32 %v74_v13, 0.0 }
  0x8f   :  { %v80_v16 = vmax.f32 %v77_v14, 0.0 }
  0x90   :  { %81 = vst [vmem:[#allocation5] sm:$0xff] %v79_v15 }
  0x91   :  { %82 = vst [vmem:[#allocation5 + $0x8] sm:$0xff] %v80_v16 }
  0x92   :  { %95 = dma.vmem_to_hbm [thread:$0]  %s88_s27, 256, %s90_s0, [#allocation4], %s167_s17, %s167_s17, %s168_s18  }
  0x93   :  { %164 = dma.done.wait [#allocation4], 256  }
  0x94   :  { %165 = vsyncadd [#allocation4], 4294967040 }
  0x95   :  { %100 = vsyncpa [#allocation3], 1 }
  0x96   :  { %101 = vsyncpa [#allocation4], 1 }

</bundles_post_ra>
